<compile_context>
chip_gen: v7x
topology: tpu7x:2x2x1
jax: 0.10.0
libtpu: 0.0.40
codegen_flags: <defaults>
</compile_context>

<pallas_src>
import jax
import jax.numpy as jnp
from jax.experimental import pallas as pl
from jax.experimental.pallas import tpu as pltpu

_EPS = 1e-5
_LP = 8   # width offset of the conv interior inside the padded scratch:
          # a multiple of 8 so the big interior store is sublane-aligned;
          # the 1-wide halo columns live at _LP-1 and _LP+wh.


# ----------------------------- in-kernel helpers -----------------------------

def _fill_padded(ppad_ref, interior, nb, hh, wh):
    """Write `interior` (nb, hh, wh, C) into the padded scratch
    (nb, hh+2, _LP+wh+1, C).  Only the halo rows/columns actually read by the
    3x3 taps are zeroed; the interior store is sublane-aligned (offset _LP)."""
    c = ppad_ref.shape[3]
    wpad = ppad_ref.shape[2]
    zrow = jnp.zeros((nb, 1, wpad, c), jnp.float32)
    ppad_ref[:, 0:1, :, :] = zrow                        # top halo row
    ppad_ref[:, hh + 1:hh + 2, :, :] = zrow              # bottom halo row
    zcol = jnp.zeros((nb, hh + 2, 1, c), jnp.float32)
    ppad_ref[:, :, _LP - 1:_LP, :] = zcol                # left halo column
    ppad_ref[:, :, _LP + wh:_LP + wh + 1, :] = zcol      # right halo column
    ppad_ref[:, 1:hh + 1, _LP:_LP + wh, :] = interior    # aligned interior store


def _conv3x3_from_padded(ppad_ref, w_ref, nb, hh, wh):
    """3x3 'same' conv as 9 shifted-plane MXU matmuls, each
    (nb*hh*wh, C) @ (C, Cout) with bf16 operands and f32 accumulation."""
    m = nb * hh * wh
    cout = w_ref.shape[2]
    acc = jnp.zeros((m, cout), jnp.float32)
    for dy in range(3):
        for dx in range(3):
            tap = ppad_ref[:, dy:dy + hh, _LP - 1 + dx:_LP - 1 + dx + wh, :]
            acc = acc + jnp.dot(
                tap.reshape(m, tap.shape[-1]).astype(jnp.bfloat16),
                w_ref[dy * 3 + dx],
                preferred_element_type=jnp.float32)
    return acc                                           # (m, Cout) f32


def _partial_stats(ym):
    """Single-store BN partial stats: (sum, sumsq) over all rows -> (2, C)."""
    return jnp.sum(jnp.stack([ym, ym * ym], axis=0), axis=1)


# --------------------------------- kernels -----------------------------------

def _pool_conv1_kernel(x_ref, w_ref, y_ref, st_ref, ppad_ref):
    # x_ref: (nb, hh, 2, wh, 2*cin) f32   w_ref: (9, cin, cmid) bf16
    # y_ref: (nb*hh*wh, cmid) bf16        st_ref: (1, 2, cmid) f32
    nb, hh, _, wh, cin2 = x_ref.shape
    cin = cin2 // 2

    # fused 2x2 max pool (pool window baked into the dims by a free wrapper reshape)
    xb = x_ref[...]
    mrow = jnp.maximum(xb[:, :, 0, :, :], xb[:, :, 1, :, :])   # max over the row pair
    pooled = jnp.maximum(mrow[..., :cin], mrow[..., cin:])     # max over the col pair

    _fill_padded(ppad_ref, pooled, nb, hh, wh)
    ym = _conv3x3_from_padded(ppad_ref, w_ref, nb, hh, wh)     # (m, cmid) f32

    st_ref[0] = _partial_stats(ym)                 # one (2, cmid) stats store
    y_ref[...] = ym.astype(jnp.bfloat16)           # bf16 intermediate (half the HBM)


def _bnrelu_conv2_kernel(y1_ref, sc_ref, sh_ref, w_ref, y2_ref, st_ref, ppad_ref):
    # y1_ref: (nb*hh*wh, cmid) bf16    sc/sh: (1, cmid) f32
    # y2_ref: (nb*hh*wh, cout) f32     st_ref: (1, 2, cout) f32
    nb = ppad_ref.shape[0]
    hh = ppad_ref.shape[1] - 2
    wh = ppad_ref.shape[2] - (_LP + 1)
    cmid = y1_ref.shape[1]

    a = jnp.maximum(y1_ref[...].astype(jnp.float32) * sc_ref[...] + sh_ref[...], 0.0)

    _fill_padded(ppad_ref, a.reshape(nb, hh, wh, cmid), nb, hh, wh)
    ym = _conv3x3_from_padded(ppad_ref, w_ref, nb, hh, wh)     # (m, cout) f32

    st_ref[0] = _partial_stats(ym)
    y2_ref[...] = ym


# --------------------------------- wrapper -----------------------------------

def _bn_affine(stats, gamma, beta, cnt):
    """Finalize per-block (sum, sumsq) partials -> per-channel (scale, shift)."""
    s = jnp.sum(stats[:, 0, :], axis=0)
    ss = jnp.sum(stats[:, 1, :], axis=0)
    mean = s / cnt
    var = jnp.maximum(ss / cnt - mean * mean, 0.0)   # biased batch variance
    inv = jax.lax.rsqrt(var + _EPS)
    scale = gamma.astype(jnp.float32) * inv
    shift = beta.astype(jnp.float32) - mean * scale
    return scale.reshape(1, -1), shift.reshape(1, -1)


def _pick_images_per_block(n, m_img):
    """Largest divisor of N such that nb*m_img targets >= 256 MXU rows per step."""
    target = max(1, (256 + m_img - 1) // m_img)
    nb = 1
    for d in range(1, n + 1):
        if n % d == 0 and d <= target:
            nb = d
    return nb


def down_forward(x_nchw, w1, g1, b1, w2, g2, b2):
    """Pallas implementation of Down.forward.  x_nchw: (N, Cin, H, W) float32.
    w1: (Cmid, Cin, 3, 3), w2: (Cout, Cmid, 3, 3) (PyTorch OIHW), g/b: BN affine."""
    n, cin, h, w = x_nchw.shape
    cmid, cout = w1.shape[0], w2.shape[0]
    assert h % 2 == 0 and w % 2 == 0, "MaxPool2d(2) assumes even H, W"
    hh, wh = h // 2, w // 2
    m_img = hh * wh
    nb = _pick_images_per_block(n, m_img)     # images per grid step
    nblk = n // nb
    mb = nb * m_img                           # matmul rows per grid step

    # layout glue (free reshapes / transposes; weights cast to bf16 for the MXU)
    x = jnp.transpose(x_nchw, (0, 2, 3, 1)).astype(jnp.float32)     # NHWC
    x5 = x.reshape(n, hh, 2, wh, 2 * cin)     # bakes the 2x2 pool window into dims
    w1k = jnp.transpose(w1, (2, 3, 1, 0)).reshape(9, cin, cmid).astype(jnp.bfloat16)
    w2k = jnp.transpose(w2, (2, 3, 1, 0)).reshape(9, cmid, cout).astype(jnp.bfloat16)

    # no vmem_limit_bytes: footprint is KBs; default scoped cap leaves headroom on v7x
    cparams = pltpu.CompilerParams(dimension_semantics=("parallel",))

    # ---- call 1: maxpool + conv1 + BN1 partial stats ----
    y1, st1 = pl.pallas_call(
        _pool_conv1_kernel,
        grid=(nblk,),
        in_specs=[
            pl.BlockSpec((nb, hh, 2, wh, 2 * cin), lambda i: (i, 0, 0, 0, 0)),
            pl.BlockSpec((9, cin, cmid), lambda i: (0, 0, 0)),
        ],
        out_specs=[
            pl.BlockSpec((mb, cmid), lambda i: (i, 0)),
            pl.BlockSpec((1, 2, cmid), lambda i: (i, 0, 0)),
        ],
        out_shape=[
            jax.ShapeDtypeStruct((n * m_img, cmid), jnp.bfloat16),
            jax.ShapeDtypeStruct((nblk, 2, cmid), jnp.float32),
        ],
        scratch_shapes=[pltpu.VMEM((nb, hh + 2, _LP + wh + 1, cin), jnp.float32)],
        compiler_params=cparams,
        cost_estimate=pl.CostEstimate(
            flops=2 * n * m_img * 9 * cin * cmid + 3 * n * m_img * cin,
            transcendentals=0,
            bytes_accessed=4 * n * h * w * cin + 2 * 9 * cin * cmid
                           + 2 * n * m_img * cmid + 4 * nblk * 2 * cmid),
    )(x5, w1k)

    scale1, shift1 = _bn_affine(st1, g1, b1, float(n * m_img))

    # ---- call 2: BN1 + ReLU + conv2 + BN2 partial stats ----
    y2, st2 = pl.pallas_call(
        _bnrelu_conv2_kernel,
        grid=(nblk,),
        in_specs=[
            pl.BlockSpec((mb, cmid), lambda i: (i, 0)),
            pl.BlockSpec((1, cmid), lambda i: (0, 0)),
            pl.BlockSpec((1, cmid), lambda i: (0, 0)),
            pl.BlockSpec((9, cmid, cout), lambda i: (0, 0, 0)),
        ],
        out_specs=[
            pl.BlockSpec((mb, cout), lambda i: (i, 0)),
            pl.BlockSpec((1, 2, cout), lambda i: (i, 0, 0)),
        ],
        out_shape=[
            jax.ShapeDtypeStruct((n * m_img, cout), jnp.float32),
            jax.ShapeDtypeStruct((nblk, 2, cout), jnp.float32),
        ],
        scratch_shapes=[pltpu.VMEM((nb, hh + 2, _LP + wh + 1, cmid), jnp.float32)],
        compiler_params=cparams,
        cost_estimate=pl.CostEstimate(
            flops=2 * n * m_img * 9 * cmid * cout + 4 * n * m_img * cmid,
            transcendentals=0,
            bytes_accessed=2 * n * m_img * cmid + 2 * 9 * cmid * cout
                           + 4 * n * m_img * cout + 4 * nblk * 2 * cout),
    )(y1, scale1, shift1, w2k)

    scale2, shift2 = _bn_affine(st2, g2, b2, float(n * m_img))

    # ---- epilogue: BN2 + ReLU + layout, plain jnp (XLA fuses into the transpose) ----
    out = jnp.maximum(y2 * scale2 + shift2, 0.0).reshape(n, hh, wh, cout)
    return jnp.transpose(out, (0, 3, 1, 2))   # back to NCHW


# -------------------------------- reference ----------------------------------

def down_reference(x, w1, g1, b1, w2, g2, b2):
    """Pure-JAX f32 reference with the module's semantics (NCHW)."""
    p = jax.lax.reduce_window(x, -jnp.inf, jax.lax.max,
                              (1, 1, 2, 2), (1, 1, 2, 2), "VALID")

    def conv(v, w):
        return jax.lax.conv_general_dilated(
            v, w, window_strides=(1, 1), padding=((1, 1), (1, 1)),
            dimension_numbers=("NCHW", "OIHW", "NCHW"),
            precision=jax.lax.Precision.HIGHEST)

    def bn_relu(v, g, b):
        mean = jnp.mean(v, axis=(0, 2, 3), keepdims=True)
        var = jnp.mean((v - mean) ** 2, axis=(0, 2, 3), keepdims=True)
        y = (v - mean) / jnp.sqrt(var + _EPS) * g.reshape(1, -1, 1, 1) + b.reshape(1, -1, 1, 1)
        return jnp.maximum(y, 0.0)

    y = bn_relu(conv(p, w1), g1, b1)
    y = bn_relu(conv(y, w2), g2, b2)
    return y


if __name__ == "__main__":
    key = jax.random.PRNGKey(0)
    kx, k1, k2 = jax.random.split(key, 3)

    N, Cin, H, W = 2, 4, 16, 16      # Down(in_channels=4, out_channels=8)
    Cout = 8
    Cmid = Cout                      # DoubleConv default mid_channels = out_channels

    x = jax.random.normal(kx, (N, Cin, H, W), jnp.float32)
    w1 = 0.2 * jax.random.normal(k1, (Cmid, Cin, 3, 3), jnp.float32)
    w2 = 0.2 * jax.random.normal(k2, (Cout, Cmid, 3, 3), jnp.float32)
    g1 = 1.0 + 0.10 * jnp.arange(Cmid, dtype=jnp.float32)
    b1 = 0.05 * jnp.arange(Cmid, dtype=jnp.float32)
    g2 = 1.0 - 0.05 * jnp.arange(Cout, dtype=jnp.float32)
    b2 = -0.02 * jnp.arange(Cout, dtype=jnp.float32)

    out = jax.block_until_ready(down_forward(x, w1, g1, b1, w2, g2, b2))
    ref = jax.block_until_ready(down_reference(x, w1, g1, b1, w2, g2, b2))

    assert out.shape == (N, Cout, H // 2, W // 2), out.shape
    # Tolerance sized for bf16 MXU operands (~2^-8 relative rounding propagated
    # through two 3x3 convs); BN statistics and accumulation remain f32.
    max_err = float(jnp.max(jnp.abs(out - ref)))
    assert max_err < 6e-2, f"max abs err = {max_err}"
    print("KERNEL_OK")
</pallas_src>

<mosaic_0001>
module attributes {stable_mosaic.version = 11 : i64} {
  func.func @_pool_conv1_kernel(%arg0: i32, %arg1: memref<2x8x2x8x8xf32, #tpu.memory_space<vmem>>, %arg2: memref<9x4x8xbf16, #tpu.memory_space<vmem>>, %arg3: memref<128x8xbf16, #tpu.memory_space<vmem>>, %arg4: memref<1x2x8xf32, #tpu.memory_space<vmem>>, %arg5: memref<2x10x17x4xf32, #tpu.memory_space<vmem>>) attributes {dimension_semantics = [#tpu.dimension_semantics<parallel>], iteration_bounds = array<i64: 1>, scalar_prefetch = 0 : i64, scratch_operands = 1 : i64, tpu.core_type = #tpu.core_type<tc>, window_params = [{transform_indices = @transform_0, window_bounds = array<i64: 2, 8, 2, 8, 8>}, {pipeline_mode = #tpu.pipeline_mode<synchronous>, transform_indices = @transform_1, window_bounds = array<i64: 9, 4, 8>}, {transform_indices = @transform_2, window_bounds = array<i64: 128, 8>}, {transform_indices = @transform_3, window_bounds = array<i64: 1, 2, 8>}]} {
    %c0 = arith.constant 0 : index
    %c0_0 = arith.constant 0 : index
    %c0_1 = arith.constant 0 : index
    %c0_2 = arith.constant 0 : index
    %c0_3 = arith.constant 0 : index
    %0 = vector.load %arg1[%c0, %c0_0, %c0_1, %c0_2, %c0_3] : memref<2x8x2x8x8xf32, #tpu.memory_space<vmem>>, vector<2x8x2x8x8xf32>
    %1 = vector.extract_strided_slice %0 {offsets = [0, 0, 0, 0, 0], sizes = [2, 8, 1, 8, 8], strides = [1, 1, 1, 1, 1]} : vector<2x8x2x8x8xf32> to vector<2x8x1x8x8xf32>
    %2 = vector.shape_cast %1 : vector<2x8x1x8x8xf32> to vector<2x8x8x8xf32>
    %3 = vector.extract_strided_slice %0 {offsets = [0, 0, 1, 0, 0], sizes = [2, 8, 1, 8, 8], strides = [1, 1, 1, 1, 1]} : vector<2x8x2x8x8xf32> to vector<2x8x1x8x8xf32>
    %4 = vector.shape_cast %3 : vector<2x8x1x8x8xf32> to vector<2x8x8x8xf32>
    %5 = arith.maximumf %2, %4 : vector<2x8x8x8xf32>
    %6 = vector.extract_strided_slice %5 {offsets = [0, 0, 0, 0], sizes = [2, 8, 8, 4], strides = [1, 1, 1, 1]} : vector<2x8x8x8xf32> to vector<2x8x8x4xf32>
    %7 = vector.extract_strided_slice %5 {offsets = [0, 0, 0, 4], sizes = [2, 8, 8, 4], strides = [1, 1, 1, 1]} : vector<2x8x8x8xf32> to vector<2x8x8x4xf32>
    %8 = arith.maximumf %6, %7 : vector<2x8x8x4xf32>
    %cst = arith.constant 0.000000e+00 : f32
    %9 = vector.broadcast %cst : f32 to vector<2x1x17x4xf32>
    %c0_4 = arith.constant 0 : index
    %c0_5 = arith.constant 0 : index
    %c0_6 = arith.constant 0 : index
    %c0_7 = arith.constant 0 : index
    %10 = vector.load %arg5[%c0_4, %c0_5, %c0_6, %c0_7] : memref<2x10x17x4xf32, #tpu.memory_space<vmem>>, vector<2x1x17x4xf32>
    tpu.vector_store %arg5[%c0_4, %c0_5, %c0_6, %c0_7], %9 {strides = array<i32>} : memref<2x10x17x4xf32, #tpu.memory_space<vmem>>, vector<2x1x17x4xf32>,
    %c0_8 = arith.constant 0 : index
    %c9 = arith.constant 9 : index
    %c0_9 = arith.constant 0 : index
    %c0_10 = arith.constant 0 : index
    %11 = vector.load %arg5[%c0_8, %c9, %c0_9, %c0_10] : memref<2x10x17x4xf32, #tpu.memory_space<vmem>>, vector<2x1x17x4xf32>
    tpu.vector_store %arg5[%c0_8, %c9, %c0_9, %c0_10], %9 {strides = array<i32>} : memref<2x10x17x4xf32, #tpu.memory_space<vmem>>, vector<2x1x17x4xf32>,
    %cst_11 = arith.constant 0.000000e+00 : f32
    %12 = vector.broadcast %cst_11 : f32 to vector<2x10x1x4xf32>
    %c0_12 = arith.constant 0 : index
    %c0_13 = arith.constant 0 : index
    %c7 = arith.constant 7 : index
    %c0_14 = arith.constant 0 : index
    %13 = vector.load %arg5[%c0_12, %c0_13, %c7, %c0_14] : memref<2x10x17x4xf32, #tpu.memory_space<vmem>>, vector<2x10x1x4xf32>
    tpu.vector_store %arg5[%c0_12, %c0_13, %c7, %c0_14], %12 {strides = array<i32>} : memref<2x10x17x4xf32, #tpu.memory_space<vmem>>, vector<2x10x1x4xf32>,
    %c0_15 = arith.constant 0 : index
    %c0_16 = arith.constant 0 : index
    %c16 = arith.constant 16 : index
    %c0_17 = arith.constant 0 : index
    %14 = vector.load %arg5[%c0_15, %c0_16, %c16, %c0_17] : memref<2x10x17x4xf32, #tpu.memory_space<vmem>>, vector<2x10x1x4xf32>
    tpu.vector_store %arg5[%c0_15, %c0_16, %c16, %c0_17], %12 {strides = array<i32>} : memref<2x10x17x4xf32, #tpu.memory_space<vmem>>, vector<2x10x1x4xf32>,
    %c0_18 = arith.constant 0 : index
    %c1 = arith.constant 1 : index
    %c8 = arith.constant 8 : index
    %c0_19 = arith.constant 0 : index
    %15 = vector.load %arg5[%c0_18, %c1, %c8, %c0_19] : memref<2x10x17x4xf32, #tpu.memory_space<vmem>>, vector<2x8x8x4xf32>
    tpu.vector_store %arg5[%c0_18, %c1, %c8, %c0_19], %8 {strides = array<i32>} : memref<2x10x17x4xf32, #tpu.memory_space<vmem>>, vector<2x8x8x4xf32>,
    %cst_20 = arith.constant 0.000000e+00 : f32
    %16 = vector.broadcast %cst_20 : f32 to vector<128x8xf32>
    %c0_21 = arith.constant 0 : index
    %c0_22 = arith.constant 0 : index
    %c7_23 = arith.constant 7 : index
    %c0_24 = arith.constant 0 : index
    %17 = vector.load %arg5[%c0_21, %c0_22, %c7_23, %c0_24] : memref<2x10x17x4xf32, #tpu.memory_space<vmem>>, vector<2x8x8x4xf32>
    %18 = vector.shape_cast %17 : vector<2x8x8x4xf32> to vector<128x4xf32>
    %19 = arith.truncf %18 : vector<128x4xf32> to vector<128x4xbf16>
    %c0_25 = arith.constant 0 : index
    %c0_26 = arith.constant 0 : index
    %c0_27 = arith.constant 0 : index
    %20 = vector.load %arg2[%c0_25, %c0_26, %c0_27] : memref<9x4x8xbf16, #tpu.memory_space<vmem>>, vector<1x4x8xbf16>
    %21 = vector.shape_cast %20 : vector<1x4x8xbf16> to vector<4x8xbf16>
    %cst_28 = arith.constant dense<0.000000e+00> : vector<128x8xf32>
    %22 = tpu.matmul %19, %21, %cst_28 {dimension_numbers = #tpu.dot_dimension_numbers<[1], [0], [0], [1], [0, 0, 1, 1], [], []>} : vector<128x4xbf16>, vector<4x8xbf16>, vector<128x8xf32> -> vector<128x8xf32>
    %23 = arith.addf %16, %22 : vector<128x8xf32>
    %c0_29 = arith.constant 0 : index
    %c0_30 = arith.constant 0 : index
    %c8_31 = arith.constant 8 : index
    %c0_32 = arith.constant 0 : index
    %24 = vector.load %arg5[%c0_29, %c0_30, %c8_31, %c0_32] : memref<2x10x17x4xf32, #tpu.memory_space<vmem>>, vector<2x8x8x4xf32>
    %25 = vector.shape_cast %24 : vector<2x8x8x4xf32> to vector<128x4xf32>
    %26 = arith.truncf %25 : vector<128x4xf32> to vector<128x4xbf16>
    %c1_33 = arith.constant 1 : index
    %c0_34 = arith.constant 0 : index
    %c0_35 = arith.constant 0 : index
    %27 = vector.load %arg2[%c1_33, %c0_34, %c0_35] : memref<9x4x8xbf16, #tpu.memory_space<vmem>>, vector<1x4x8xbf16>
    %28 = vector.shape_cast %27 : vector<1x4x8xbf16> to vector<4x8xbf16>
    %cst_36 = arith.constant dense<0.000000e+00> : vector<128x8xf32>
    %29 = tpu.matmul %26, %28, %cst_36 {dimension_numbers = #tpu.dot_dimension_numbers<[1], [0], [0], [1], [0, 0, 1, 1], [], []>} : vector<128x4xbf16>, vector<4x8xbf16>, vector<128x8xf32> -> vector<128x8xf32>
    %30 = arith.addf %23, %29 : vector<128x8xf32>
    %c0_37 = arith.constant 0 : index
    %c0_38 = arith.constant 0 : index
    %c9_39 = arith.constant 9 : index
    %c0_40 = arith.constant 0 : index
    %31 = vector.load %arg5[%c0_37, %c0_38, %c9_39, %c0_40] : memref<2x10x17x4xf32, #tpu.memory_space<vmem>>, vector<2x8x8x4xf32>
    %32 = vector.shape_cast %31 : vector<2x8x8x4xf32> to vector<128x4xf32>
    %33 = arith.truncf %32 : vector<128x4xf32> to vector<128x4xbf16>
    %c2 = arith.constant 2 : index
    %c0_41 = arith.constant 0 : index
    %c0_42 = arith.constant 0 : index
    %34 = vector.load %arg2[%c2, %c0_41, %c0_42] : memref<9x4x8xbf16, #tpu.memory_space<vmem>>, vector<1x4x8xbf16>
    %35 = vector.shape_cast %34 : vector<1x4x8xbf16> to vector<4x8xbf16>
    %cst_43 = arith.constant dense<0.000000e+00> : vector<128x8xf32>
    %36 = tpu.matmul %33, %35, %cst_43 {dimension_numbers = #tpu.dot_dimension_numbers<[1], [0], [0], [1], [0, 0, 1, 1], [], []>} : vector<128x4xbf16>, vector<4x8xbf16>, vector<128x8xf32> -> vector<128x8xf32>
    %37 = arith.addf %30, %36 : vector<128x8xf32>
    %c0_44 = arith.constant 0 : index
    %c1_45 = arith.constant 1 : index
    %c7_46 = arith.constant 7 : index
    %c0_47 = arith.constant 0 : index
    %38 = vector.load %arg5[%c0_44, %c1_45, %c7_46, %c0_47] : memref<2x10x17x4xf32, #tpu.memory_space<vmem>>, vector<2x8x8x4xf32>
    %39 = vector.shape_cast %38 : vector<2x8x8x4xf32> to vector<128x4xf32>
    %40 = arith.truncf %39 : vector<128x4xf32> to vector<128x4xbf16>
    %c3 = arith.constant 3 : index
    %c0_48 = arith.constant 0 : index
    %c0_49 = arith.constant 0 : index
    %41 = vector.load %arg2[%c3, %c0_48, %c0_49] : memref<9x4x8xbf16, #tpu.memory_space<vmem>>, vector<1x4x8xbf16>
    %42 = vector.shape_cast %41 : vector<1x4x8xbf16> to vector<4x8xbf16>
    %cst_50 = arith.constant dense<0.000000e+00> : vector<128x8xf32>
    %43 = tpu.matmul %40, %42, %cst_50 {dimension_numbers = #tpu.dot_dimension_numbers<[1], [0], [0], [1], [0, 0, 1, 1], [], []>} : vector<128x4xbf16>, vector<4x8xbf16>, vector<128x8xf32> -> vector<128x8xf32>
    %44 = arith.addf %37, %43 : vector<128x8xf32>
    %c0_51 = arith.constant 0 : index
    %c1_52 = arith.constant 1 : index
    %c8_53 = arith.constant 8 : index
    %c0_54 = arith.constant 0 : index
    %45 = vector.load %arg5[%c0_51, %c1_52, %c8_53, %c0_54] : memref<2x10x17x4xf32, #tpu.memory_space<vmem>>, vector<2x8x8x4xf32>
    %46 = vector.shape_cast %45 : vector<2x8x8x4xf32> to vector<128x4xf32>
    %47 = arith.truncf %46 : vector<128x4xf32> to vector<128x4xbf16>
    %c4 = arith.constant 4 : index
    %c0_55 = arith.constant 0 : index
    %c0_56 = arith.constant 0 : index
    %48 = vector.load %arg2[%c4, %c0_55, %c0_56] : memref<9x4x8xbf16, #tpu.memory_space<vmem>>, vector<1x4x8xbf16>
    %49 = vector.shape_cast %48 : vector<1x4x8xbf16> to vector<4x8xbf16>
    %cst_57 = arith.constant dense<0.000000e+00> : vector<128x8xf32>
    %50 = tpu.matmul %47, %49, %cst_57 {dimension_numbers = #tpu.dot_dimension_numbers<[1], [0], [0], [1], [0, 0, 1, 1], [], []>} : vector<128x4xbf16>, vector<4x8xbf16>, vector<128x8xf32> -> vector<128x8xf32>
    %51 = arith.addf %44, %50 : vector<128x8xf32>
    %c0_58 = arith.constant 0 : index
    %c1_59 = arith.constant 1 : index
    %c9_60 = arith.constant 9 : index
    %c0_61 = arith.constant 0 : index
    %52 = vector.load %arg5[%c0_58, %c1_59, %c9_60, %c0_61] : memref<2x10x17x4xf32, #tpu.memory_space<vmem>>, vector<2x8x8x4xf32>
    %53 = vector.shape_cast %52 : vector<2x8x8x4xf32> to vector<128x4xf32>
    %54 = arith.truncf %53 : vector<128x4xf32> to vector<128x4xbf16>
    %c5 = arith.constant 5 : index
    %c0_62 = arith.constant 0 : index
    %c0_63 = arith.constant 0 : index
    %55 = vector.load %arg2[%c5, %c0_62, %c0_63] : memref<9x4x8xbf16, #tpu.memory_space<vmem>>, vector<1x4x8xbf16>
    %56 = vector.shape_cast %55 : vector<1x4x8xbf16> to vector<4x8xbf16>
    %cst_64 = arith.constant dense<0.000000e+00> : vector<128x8xf32>
    %57 = tpu.matmul %54, %56, %cst_64 {dimension_numbers = #tpu.dot_dimension_numbers<[1], [0], [0], [1], [0, 0, 1, 1], [], []>} : vector<128x4xbf16>, vector<4x8xbf16>, vector<128x8xf32> -> vector<128x8xf32>
    %58 = arith.addf %51, %57 : vector<128x8xf32>
    %c0_65 = arith.constant 0 : index
    %c2_66 = arith.constant 2 : index
    %c7_67 = arith.constant 7 : index
    %c0_68 = arith.constant 0 : index
    %59 = vector.load %arg5[%c0_65, %c2_66, %c7_67, %c0_68] : memref<2x10x17x4xf32, #tpu.memory_space<vmem>>, vector<2x8x8x4xf32>
    %60 = vector.shape_cast %59 : vector<2x8x8x4xf32> to vector<128x4xf32>
    %61 = arith.truncf %60 : vector<128x4xf32> to vector<128x4xbf16>
    %c6 = arith.constant 6 : index
    %c0_69 = arith.constant 0 : index
    %c0_70 = arith.constant 0 : index
    %62 = vector.load %arg2[%c6, %c0_69, %c0_70] : memref<9x4x8xbf16, #tpu.memory_space<vmem>>, vector<1x4x8xbf16>
    %63 = vector.shape_cast %62 : vector<1x4x8xbf16> to vector<4x8xbf16>
    %cst_71 = arith.constant dense<0.000000e+00> : vector<128x8xf32>
    %64 = tpu.matmul %61, %63, %cst_71 {dimension_numbers = #tpu.dot_dimension_numbers<[1], [0], [0], [1], [0, 0, 1, 1], [], []>} : vector<128x4xbf16>, vector<4x8xbf16>, vector<128x8xf32> -> vector<128x8xf32>
    %65 = arith.addf %58, %64 : vector<128x8xf32>
    %c0_72 = arith.constant 0 : index
    %c2_73 = arith.constant 2 : index
    %c8_74 = arith.constant 8 : index
    %c0_75 = arith.constant 0 : index
    %66 = vector.load %arg5[%c0_72, %c2_73, %c8_74, %c0_75] : memref<2x10x17x4xf32, #tpu.memory_space<vmem>>, vector<2x8x8x4xf32>
    %67 = vector.shape_cast %66 : vector<2x8x8x4xf32> to vector<128x4xf32>
    %68 = arith.truncf %67 : vector<128x4xf32> to vector<128x4xbf16>
    %c7_76 = arith.constant 7 : index
    %c0_77 = arith.constant 0 : index
    %c0_78 = arith.constant 0 : index
    %69 = vector.load %arg2[%c7_76, %c0_77, %c0_78] : memref<9x4x8xbf16, #tpu.memory_space<vmem>>, vector<1x4x8xbf16>
    %70 = vector.shape_cast %69 : vector<1x4x8xbf16> to vector<4x8xbf16>
    %cst_79 = arith.constant dense<0.000000e+00> : vector<128x8xf32>
    %71 = tpu.matmul %68, %70, %cst_79 {dimension_numbers = #tpu.dot_dimension_numbers<[1], [0], [0], [1], [0, 0, 1, 1], [], []>} : vector<128x4xbf16>, vector<4x8xbf16>, vector<128x8xf32> -> vector<128x8xf32>
    %72 = arith.addf %65, %71 : vector<128x8xf32>
    %c0_80 = arith.constant 0 : index
    %c2_81 = arith.constant 2 : index
    %c9_82 = arith.constant 9 : index
    %c0_83 = arith.constant 0 : index
    %73 = vector.load %arg5[%c0_80, %c2_81, %c9_82, %c0_83] : memref<2x10x17x4xf32, #tpu.memory_space<vmem>>, vector<2x8x8x4xf32>
    %74 = vector.shape_cast %73 : vector<2x8x8x4xf32> to vector<128x4xf32>
    %75 = arith.truncf %74 : vector<128x4xf32> to vector<128x4xbf16>
    %c8_84 = arith.constant 8 : index
    %c0_85 = arith.constant 0 : index
    %c0_86 = arith.constant 0 : index
    %76 = vector.load %arg2[%c8_84, %c0_85, %c0_86] : memref<9x4x8xbf16, #tpu.memory_space<vmem>>, vector<1x4x8xbf16>
    %77 = vector.shape_cast %76 : vector<1x4x8xbf16> to vector<4x8xbf16>
    %cst_87 = arith.constant dense<0.000000e+00> : vector<128x8xf32>
    %78 = tpu.matmul %75, %77, %cst_87 {dimension_numbers = #tpu.dot_dimension_numbers<[1], [0], [0], [1], [0, 0, 1, 1], [], []>} : vector<128x4xbf16>, vector<4x8xbf16>, vector<128x8xf32> -> vector<128x8xf32>
    %79 = arith.addf %72, %78 : vector<128x8xf32>
    %80 = arith.mulf %79, %79 : vector<128x8xf32>
    %81 = vector.shape_cast %79 : vector<128x8xf32> to vector<1x128x8xf32>
    %82 = vector.shape_cast %80 : vector<128x8xf32> to vector<1x128x8xf32>
    %83 = tpu.concatenate %81, %82 in 0 : vector<1x128x8xf32>, vector<1x128x8xf32> -> vector<2x128x8xf32>
    %cst_88 = arith.constant dense<0.000000e+00> : vector<2x8xf32>
    %84 = vector.multi_reduction <add>, %83, %cst_88 [1] : vector<2x128x8xf32> to vector<2x8xf32>
    %c0_89 = arith.constant 0 : index
    %c0_90 = arith.constant 0 : index
    %c0_91 = arith.constant 0 : index
    %85 = vector.load %arg4[%c0_89, %c0_90, %c0_91] : memref<1x2x8xf32, #tpu.memory_space<vmem>>, vector<1x2x8xf32>
    %86 = vector.shape_cast %85 : vector<1x2x8xf32> to vector<2x8xf32>
    %87 = vector.shape_cast %84 : vector<2x8xf32> to vector<1x2x8xf32>
    tpu.vector_store %arg4[%c0_89, %c0_90, %c0_91], %87 {strides = array<i32>} : memref<1x2x8xf32, #tpu.memory_space<vmem>>, vector<1x2x8xf32>,
    %88 = arith.truncf %79 : vector<128x8xf32> to vector<128x8xbf16>
    %c0_92 = arith.constant 0 : index
    %c0_93 = arith.constant 0 : index
    %89 = vector.load %arg3[%c0_92, %c0_93] : memref<128x8xbf16, #tpu.memory_space<vmem>>, vector<128x8xbf16>
    tpu.vector_store %arg3[%c0_92, %c0_93], %88 {strides = array<i32>} : memref<128x8xbf16, #tpu.memory_space<vmem>>, vector<128x8xbf16>,
    return
  }
  func.func @transform_0(%arg0: i32) -> (i32, i32, i32, i32, i32) {
    %c0_i32 = arith.constant 0 : i32
    %c0_i32_0 = arith.constant 0 : i32
    %c0_i32_1 = arith.constant 0 : i32
    %c0_i32_2 = arith.constant 0 : i32
    %c0_i32_3 = arith.constant 0 : i32
    return %arg0, %c0_i32, %c0_i32_0, %c0_i32_1, %c0_i32_2 : i32, i32, i32, i32, i32
  }
  func.func @transform_1(%arg0: i32) -> (i32, i32, i32) {
    %c0_i32 = arith.constant 0 : i32
    %c0_i32_0 = arith.constant 0 : i32
    %c0_i32_1 = arith.constant 0 : i32
    %c0_i32_2 = arith.constant 0 : i32
    return %c0_i32, %c0_i32_0, %c0_i32_1 : i32, i32, i32
  }
  func.func @transform_2(%arg0: i32) -> (i32, i32) {
    %c0_i32 = arith.constant 0 : i32
    %c0_i32_0 = arith.constant 0 : i32
    return %arg0, %c0_i32 : i32, i32
  }
  func.func @transform_3(%arg0: i32) -> (i32, i32, i32) {
    %c0_i32 = arith.constant 0 : i32
    %c0_i32_0 = arith.constant 0 : i32
    %c0_i32_1 = arith.constant 0 : i32
    return %arg0, %c0_i32, %c0_i32_0 : i32, i32, i32
  }
}

</mosaic_0001>

<bundles_post_ra>
// kernel: tpu_custom_call.1
= control target key start
LH: loop header
LB: loop body
LE: loop exit
PB: predicated region body
PF: predicated region fallthrough
CT: control target
= control target key end

     0   :  { %9 = vsyncpa [#allocation4], 0  ;;  %s3061_s0 = inlined_call_operand.hbm [shape: f32[2,8,2,8,8], index: 0, kind: input, shape index: {}]   ;;  %s3062_s1 = inlined_call_operand.vmem [shape: bf16[9,4,8], index: 1, kind: input, shape index: {}]   ;;  %s3063_s2 = inlined_call_operand.vmem [shape: bf16[128,8], index: 2, kind: output, shape index: {0}]   ;;  %s3064_s3 = inlined_call_operand.hbm [shape: f32[1,2,8], index: 3, kind: output, shape index: {1}]  }
   0x1   :  { %10 = vsyncpa [#allocation5], 0  ;;  %s2439_s12 = smov [#allocation3]   ;;  %s2391_s16 = scalar_lea.hbm %s3061_s0, 4096 }
   0x2   :  { %s16_s13 = sshll.u32 %s2439_s12, 4  ;;  %p2392_p0 = scmp.ne.s32.totalorder %s3061_s0, %s2391_s16  ;;  %s17_s13 = int_to_ptr.vmem [resolvable:$true] %s16_s13 }
   0x3   :  { %p2395_p1 = scmp.lt.u32.totalorder %s2391_s16, %s3061_s0 }
   0x5   :  { %p2397_p2 = pnand %p2395_p1, %p2392_p0 }
   0x7   :  { %2400 = shalt.err (!%p2397_p2)
}
   0x8   :  { %s2401_s21 = scalar_lea.vmem %s17_s13, 4096  ;;  %p2406_p4 = scmp.lt.s32.totalorder %s17_s13, %s17_s13 }
   0x9   :  { %p2402_p3 = scmp.ne.s32.totalorder %s17_s13, %s2401_s21  ;;  %p2407_p5 = scmp.lt.s32.totalorder %s2401_s21, %s2401_s21 }
   0xb   :  { %p2408_p6 = por %p2407_p5, %p2406_p4 }
   0xd   :  { %p2409_p7 = pnand %p2408_p6, %p2402_p3 }
   0xf   :  { %2412 = shalt.err (!%p2409_p7)
}
  0x10   :  { %s2440_s22 = smov 128   ;;  %s2441_s23 = smov 8  }
  0x11   :  { %22 = dma.hbm_to_vmem [thread:$0]  %s3061_s0, 4096, %s17_s13, [#allocation4], %s2440_s22, %s2440_s22, %s2441_s23  }
  0x12   :  { %2435 = dma.done.wait [#allocation4], 4096  }
  0x13   :  { %2436 = vsyncadd [#allocation4], 4294963200  ;;  %vm157_vm0 = vcmask 31744   ;;  %vm160_vm1 = vcmask 24576   ;;  %v2442_v0 = vmov 0.0   ;;  %v33_v1 = vld [vmem:[#allocation3 + $0x20] sm:$0xff] }
  0x14   :  { %159 = vst.msk [vmem:[#allocation2 + $0x8] sm:$0xff] %vm157_vm0, %v2442_v0  ;;  %158 = vst.msk [vmem:[#allocation2] sm:$0xff] %vm157_vm0, %v2442_v0  ;;  %v34_v2 = vld [vmem:[#allocation3 + $0x28] sm:$0xff]  ;;  %v29_v3 = vld [vmem:[#allocation3] sm:$0xff]  ;;  %s2443_s0 = smov 124   ;;  %vm304_vm2 = vcmask 1041408  }
  0x15   :  { %162 = vst.msk [vmem:[#allocation2 + $0xf0] sm:$0xff] %vm157_vm0, %v2442_v0  ;;  %163 = vst.msk [vmem:[#allocation2 + $0xf8] sm:$0xff] %vm157_vm0, %v2442_v0  ;;  %v2529_v4 = vmax.f32 %v33_v1, %v34_v2  ;;  %v30_v5 = vld [vmem:[#allocation3 + $0x8] sm:$0xff]  ;;  %v35_v6 = vld [vmem:[#allocation3 + $0x30] sm:$0xff]  ;;  %vm1854_vm3 = vcmask 60416   ;;  %vm1708_vm4 = vcmask 64512  }
  0x16   :  { %166 = vst.msk [vmem:[#allocation2 + $0xd8] sm:$0xff] %vm157_vm0, %v2442_v0  ;;  %167 = vst.msk [vmem:[#allocation2 + $0xe0] sm:$0xff] %vm157_vm0, %v2442_v0  ;;  %v36_v7 = vld [vmem:[#allocation3 + $0x38] sm:$0xff]  ;;  %v2531_v8 = vmax.f32 %v29_v3, %v30_v5  ;;  %v31_v9 = vld [vmem:[#allocation3 + $0x10] sm:$0xff]  ;;  %vm1785_vm5 = vcmask 1041409   ;;  %vm1788_vm6 = vcmask 58368  }
  0x17   :  { %169 = vst.msk [vmem:[#allocation2 + $0x1c8] sm:$0xff] %vm157_vm0, %v2442_v0  ;;  %170 = vst.msk [vmem:[#allocation2 + $0x1d0] sm:$0xff] %vm157_vm0, %v2442_v0  ;;  %v32_v10 = vld [vmem:[#allocation3 + $0x18] sm:$0xff]  ;;  %97 = vrot.lane.b32.xlu1 %v2529_v4, %s2443_s0  ;;  %v2535_v11 = vmax.f32 %v35_v6, %v36_v7  ;;  %v39_v13 = vld [vmem:[#allocation3 + $0x50] sm:$0xff] }
  0x18   :  { %193 = vst.msk [vmem:[#allocation2 + $0x28] sm:$0x1] %vm160_vm1, %v2442_v0  ;;  %194 = vst.msk [vmem:[#allocation2 + $0x40] sm:$0x1] %vm160_vm1, %v2442_v0  ;;  %93 = vrot.lane.b32.xlu0 %v2531_v8, %s2443_s0  ;;  %v2539_v12 = vmax.f32 %v31_v9, %v32_v10  ;;  %v40_v14 = vld [vmem:[#allocation3 + $0x58] sm:$0xff]  ;;  %v37_v15 = vld [vmem:[#allocation3 + $0x40] sm:$0xff] }
  0x19   :  { %161 = vst.msk [vmem:[#allocation2 + $0x10] sm:$0x1] %vm160_vm1, %v2442_v0  ;;  %164 = vst.msk [vmem:[#allocation2 + $0x100] sm:$0x1] %vm160_vm1, %v2442_v0  ;;  %v38_v16 = vld [vmem:[#allocation3 + $0x48] sm:$0xff]  ;;  %v2543_v17 = vmax.f32 %v39_v13, %v40_v14  ;;  %v43_v19 = vld [vmem:[#allocation3 + $0x70] sm:$0xff] }
  0x1a   :  { %168 = vst.msk [vmem:[#allocation2 + $0xe8] sm:$0x1] %vm160_vm1, %v2442_v0  ;;  %171 = vst.msk [vmem:[#allocation2 + $0x1d8] sm:$0x1] %vm160_vm1, %v2442_v0  ;;  %v2547_v18 = vmax.f32 %v37_v15, %v38_v16  ;;  %v44_v20 = vld [vmem:[#allocation3 + $0x78] sm:$0xff]  ;;  %v41_v21 = vld [vmem:[#allocation3 + $0x60] sm:$0xff] }
  0x1b   :  { %173 = vst.msk [vmem:[#allocation2 + $0x1f] sm:$0x1] %vm160_vm1, %v2442_v0  ;;  %174 = vst.msk [vmem:[#allocation2 + $0x37] sm:$0x1] %vm160_vm1, %v2442_v0  ;;  %99 = vrot.lane.b32.xlu1 %v2535_v11, %s2443_s0  ;;  %v42_v22 = vld [vmem:[#allocation3 + $0x68] sm:$0xff]  ;;  %v2554_v24 = vmax.f32 %v43_v19, %v44_v20  ;;  %v47_v29 = vld [vmem:[#allocation3 + $0x90] sm:$0xff] }
  0x1c   :  { %175 = vst.msk [vmem:[#allocation2 + $0x4f] sm:$0x1] %vm160_vm1, %v2442_v0  ;;  %176 = vst.msk [vmem:[#allocation2 + $0x67] sm:$0x1] %vm160_vm1, %v2442_v0  ;;  %95 = vrot.lane.b32.xlu0 %v2539_v12, %s2443_s0  ;;  %v1890_v23 = vld [vmem:[%s3062_s1 + $0x2] sm:$0x3]  ;;  %v2570_v28 = vmax.f32 %v41_v21, %v42_v22 }
  0x1d   :  { %177 = vst.msk [vmem:[#allocation2 + $0x7f] sm:$0x1] %vm160_vm1, %v2442_v0  ;;  %178 = vst.msk [vmem:[#allocation2 + $0x97] sm:$0x1] %vm160_vm1, %v2442_v0  ;;  %2375 = vmatprep.subr.msk.bf16.mxu1 %vm304_vm2, %v1890_v23  ;;  %v2560_v25 = vld [vmem:[%s3062_s1 + $0x8] sm:$0x3] }
  0x1e   :  { %179 = vst.msk [vmem:[#allocation2 + $0xaf] sm:$0x1] %vm160_vm1, %v2442_v0  ;;  %180 = vst.msk [vmem:[#allocation2 + $0xc7] sm:$0x1] %vm160_vm1, %v2442_v0  ;;  %v306_v26 = vsel %vm304_vm2, %v1890_v23, 0  ;;  %v48_v30 = vld [vmem:[#allocation3 + $0x98] sm:$0xff]  ;;  %2379 = vmatprep.subr.msk.bf16.mxu0 %vm304_vm2, %v2560_v25 }
  0x1f   :  { %183 = vst.msk [vmem:[#allocation2 + $0x10f] sm:$0x1] %vm160_vm1, %v2442_v0  ;;  %184 = vst.msk [vmem:[#allocation2 + $0x127] sm:$0x1] %vm160_vm1, %v2442_v0  ;;  %103 = vrot.lane.b32.xlu1 %v2543_v17, %s2443_s0  ;;  %v2566_v27 = vld [vmem:[%s3062_s1] sm:$0x3]  ;;  %2084 = vmatpush3.bf16.msra.mxu1 %v306_v26  ;;  %v2590_v35 = vmax.f32 %v47_v29, %v48_v30 }
  0x20   :  { %185 = vst.msk [vmem:[#allocation2 + $0x13f] sm:$0x1] %vm160_vm1, %v2442_v0  ;;  %186 = vst.msk [vmem:[#allocation2 + $0x157] sm:$0x1] %vm160_vm1, %v2442_v0  ;;  %101 = vrot.lane.b32.xlu0 %v2547_v18, %s2443_s0  ;;  %v2576_v31 = vsel %vm304_vm2, %v2560_v25, 0  ;;  %v45_v33 = vld [vmem:[#allocation3 + $0x80] sm:$0xff]  ;;  %2376 = vmatprep.subr.msk.bf16.mxu1 %vm304_vm2, %v2566_v27 }
  0x21   :  { %187 = vst.msk [vmem:[#allocation2 + $0x16f] sm:$0x1] %vm160_vm1, %v2442_v0  ;;  %188 = vst.msk [vmem:[#allocation2 + $0x187] sm:$0x1] %vm160_vm1, %v2442_v0  ;;  %v2581_v32 = vld [vmem:[%s3062_s1 + $0xa] sm:$0x3]  ;;  %2156 = vmatpush3.bf16.msra.mxu0 %v2576_v31 }
  0x22   :  { %189 = vst.msk [vmem:[#allocation2 + $0x19f] sm:$0x1] %vm160_vm1, %v2442_v0  ;;  %190 = vst.msk [vmem:[#allocation2 + $0x1b7] sm:$0x1] %vm160_vm1, %v2442_v0  ;;  %v46_v34 = vld [vmem:[#allocation3 + $0x88] sm:$0xff]  ;;  %2381 = vmatprep.subr.msk.bf16.mxu0 %vm304_vm2, %v2581_v32  ;;  %v51_v37 = vld [vmem:[#allocation3 + $0xb0] sm:$0xff] }
  0x23   :  { %195 = vst.msk [vmem:[#allocation2 + $0x58] sm:$0x1] %vm160_vm1, %v2442_v0  ;;  %196 = vst.msk [vmem:[#allocation2 + $0x70] sm:$0x1] %vm160_vm1, %v2442_v0  ;;  %107 = vrot.lane.b32.xlu1 %v2554_v24, %s2443_s0  ;;  %v2594_v36 = vmax.f32 %v45_v33, %v46_v34  ;;  %v52_v38 = vld [vmem:[#allocation3 + $0xb8] sm:$0xff]  ;;  %v49_v39 = vld [vmem:[#allocation3 + $0xa0] sm:$0xff] }
  0x24   :  { %197 = vst.msk [vmem:[#allocation2 + $0x88] sm:$0x1] %vm160_vm1, %v2442_v0  ;;  %198 = vst.msk [vmem:[#allocation2 + $0xa0] sm:$0x1] %vm160_vm1, %v2442_v0  ;;  %105 = vrot.lane.b32.xlu0 %v2570_v28, %s2443_s0  ;;  %v50_v40 = vld [vmem:[#allocation3 + $0xa8] sm:$0xff]  ;;  %v2598_v41 = vmax.f32 %v51_v37, %v52_v38  ;;  %v55_v43 = vld [vmem:[#allocation3 + $0xd0] sm:$0xff] }
  0x25   :  { %199 = vst.msk [vmem:[#allocation2 + $0xb8] sm:$0x1] %vm160_vm1, %v2442_v0  ;;  %200 = vst.msk [vmem:[#allocation2 + $0xd0] sm:$0x1] %vm160_vm1, %v2442_v0  ;;  %v2602_v42 = vmax.f32 %v49_v39, %v50_v40  ;;  %v56_v44 = vld [vmem:[#allocation3 + $0xd8] sm:$0xff]  ;;  %v53_v45 = vld [vmem:[#allocation3 + $0xc0] sm:$0xff] }
  0x26   :  { %203 = vst.msk [vmem:[#allocation2 + $0x118] sm:$0x1] %vm160_vm1, %v2442_v0  ;;  %204 = vst.msk [vmem:[#allocation2 + $0x130] sm:$0x1] %vm160_vm1, %v2442_v0  ;;  %v54_v46 = vld [vmem:[#allocation3 + $0xc8] sm:$0xff]  ;;  %v2606_v47 = vmax.f32 %v55_v43, %v56_v44  ;;  %v59_v49 = vld [vmem:[#allocation3 + $0xf0] sm:$0xff] }
  0x27   :  { %205 = vst.msk [vmem:[#allocation2 + $0x148] sm:$0x1] %vm160_vm1, %v2442_v0  ;;  %206 = vst.msk [vmem:[#allocation2 + $0x160] sm:$0x1] %vm160_vm1, %v2442_v0  ;;  %111 = vrot.lane.b32.xlu1 %v2590_v35, %s2443_s0  ;;  %v2610_v48 = vmax.f32 %v53_v45, %v54_v46  ;;  %v60_v50 = vld [vmem:[#allocation3 + $0xf8] sm:$0xff]  ;;  %v57_v51 = vld [vmem:[#allocation3 + $0xe0] sm:$0xff] }
  0x28   :  { %207 = vst.msk [vmem:[#allocation2 + $0x178] sm:$0x1] %vm160_vm1, %v2442_v0  ;;  %208 = vst.msk [vmem:[#allocation2 + $0x190] sm:$0x1] %vm160_vm1, %v2442_v0  ;;  %109 = vrot.lane.b32.xlu0 %v2594_v36, %s2443_s0  ;;  %v58_v52 = vld [vmem:[#allocation3 + $0xe8] sm:$0xff]  ;;  %v2614_v53 = vmax.f32 %v59_v49, %v60_v50  ;;  %v1078_v20 = vsel %vm304_vm2, %v2581_v32, 0 }
  0x29   :  { %209 = vst.msk [vmem:[#allocation2 + $0x1a8] sm:$0x1] %vm160_vm1, %v2442_v0  ;;  %210 = vst.msk [vmem:[#allocation2 + $0x1c0] sm:$0x1] %vm160_vm1, %v2442_v0  ;;  %v2618_v54 = vmax.f32 %v57_v51, %v58_v52  ;;  %v254_v2 = vld [vmem:[#allocation2 + $0x8] sm:$0xff]  ;;  %v262_v43 = vld [vmem:[#allocation2 + $0xf8] sm:$0xff] }
  0x2a   :  { %172 = vst.msk [vmem:[#allocation2 + $0x7] sm:$0x1] %vm160_vm1, %v2442_v0  ;;  %181 = vst.msk [vmem:[#allocation2 + $0xdf] sm:$0x1] %vm160_vm1, %v2442_v0  ;;  %v2651_v21 = vld [vmem:[%s3062_s1 + $0x4] sm:$0x3] }
  0x2b   :  { %182 = vst.msk [vmem:[#allocation2 + $0xf7] sm:$0x1] %vm160_vm1, %v2442_v0  ;;  %191 = vst.msk [vmem:[#allocation2 + $0x1cf] sm:$0x1] %vm160_vm1, %v2442_v0  ;;  %115 = vrot.lane.b32.xlu1 %v2598_v41, %s2443_s0 }
  0x2c   :  { %192 = vst.msk [vmem:[#allocation2 + $0x10] sm:$0x1] %vm160_vm1, %v2442_v0  ;;  %201 = vst.msk [vmem:[#allocation2 + $0xe8] sm:$0x1] %vm160_vm1, %v2442_v0  ;;  %113 = vrot.lane.b32.xlu0 %v2602_v42, %s2443_s0 }
  0x2d   :  { %202 = vst.msk [vmem:[#allocation2 + $0x100] sm:$0x1] %vm160_vm1, %v2442_v0  ;;  %211 = vst.msk [vmem:[#allocation2 + $0x1d8] sm:$0x1] %vm160_vm1, %v2442_v0 }
  0x2f   :  { %119 = vrot.lane.b32.xlu1 %v2606_v47, %s2443_s0 }
  0x30   :  { %117 = vrot.lane.b32.xlu0 %v2610_v48, %s2443_s0 }
  0x33   :  { %123 = vrot.lane.b32.xlu1 %v2614_v53, %s2443_s0 }
  0x34   :  { %121 = vrot.lane.b32.xlu0 %v2618_v54, %s2443_s0 }
  0x89   :  { %v98_v55 = vpop.permute.xlu1 %97 }
  0x8a   :  { %v143_v56 = vmax.f32 %v2529_v4, %v98_v55  ;;  %v94_v57 = vpop.permute.xlu0 %93 }
  0x8b   :  { %v141_v58 = vmax.f32 %v2531_v8, %v94_v57 }
  0x8c   :  { %215 = vst.msk [vmem:[#allocation2 + $0x50] sm:$0xff] %vm157_vm0, %v143_v56 }
  0x8d   :  { %213 = vst.msk [vmem:[#allocation2 + $0x20] sm:$0xff] %vm157_vm0, %v141_v58  ;;  %v100_v59 = vpop.permute.xlu1 %99 }
  0x8e   :  { %v144_v60 = vmax.f32 %v2535_v11, %v100_v59  ;;  %v96_v61 = vpop.permute.xlu0 %95 }
  0x8f   :  { %v142_v62 = vmax.f32 %v2539_v12, %v96_v61 }
  0x90   :  { %216 = vst.msk [vmem:[#allocation2 + $0x68] sm:$0xff] %vm157_vm0, %v144_v60 }
  0x91   :  { %214 = vst.msk [vmem:[#allocation2 + $0x38] sm:$0xff] %vm157_vm0, %v142_v62  ;;  %v104_v63 = vpop.permute.xlu1 %103 }
  0x92   :  { %v102_v0 = vpop.permute.xlu0 %101  ;;  %v146_v1 = vmax.f32 %v2543_v17, %v104_v63  ;;  %v430_v17 = vsel %vm304_vm2, %v2566_v27, 0 }
  0x93   :  { %v145_v3 = vmax.f32 %v2547_v18, %v102_v0  ;;  %v257_v10 = vld [vmem:[#allocation2 + $0x50] sm:$0xff] }
  0x94   :  { %218 = vst.msk [vmem:[#allocation2 + $0x98] sm:$0xff] %vm157_vm0, %v146_v1  ;;  %v255_v4 = vld [vmem:[#allocation2 + $0x20] sm:$0xff] }
  0x95   :  { %217 = vst.msk [vmem:[#allocation2 + $0x80] sm:$0xff] %vm157_vm0, %v145_v3  ;;  %v108_v5 = vpop.permute.xlu1 %107  ;;  %v270_v6 = vpack.c.bf16 %v255_v4, %v254_v2  ;;  %v2736_v2 = vld [vmem:[%s3062_s1 + $0xe] sm:$0x3] }
  0x96   :  { %v106_v7 = vpop.permute.xlu0 %105  ;;  %v148_v8 = vmax.f32 %v2554_v24, %v108_v5  ;;  %v1943_v24 = vld [vmem:[%s3062_s1 + $0xc] sm:$0x3] }
  0x97   :  { %v147_v9 = vmax.f32 %v2570_v28, %v106_v7  ;;  %2085 = vmatprep.mubr.msk.bf16.mxu1 %vm157_vm0, %v270_v6  ;;  %v864_v11 = vld [vmem:[#allocation2 + $0x68] sm:$0xff]  ;;  %v1245_v62 = vsel %vm304_vm2, %v1943_v24, 0  ;;  %v2752_v7 = vld [vmem:[#allocation2 + $0x1f] sm:$0xff] }
  0x98   :  { %220 = vst.msk [vmem:[#allocation2 + $0xc8] sm:$0xff] %vm157_vm0, %v148_v8  ;;  %v256_v12 = vld [vmem:[#allocation2 + $0x38] sm:$0xff]  ;;  %v878_v13 = vpack.c.bf16 %v864_v11, %v257_v10  ;;  %v2704_v56 = vld [vmem:[#allocation2 + $0x69] sm:$0xff] }
  0x99   :  { %219 = vst.msk [vmem:[#allocation2 + $0xb0] sm:$0xff] %vm157_vm0, %v147_v9  ;;  %v112_v14 = vpop.permute.xlu1 %111  ;;  %v2641_v15 = vpack.c.bf16 %v257_v10, %v256_v12  ;;  %v877_v16 = vpack.c.bf16 %v256_v12, %v255_v4  ;;  %v229_v5 = vld [vmem:[#allocation2 + $0x7] sm:$0xff] }
  0x9a   :  { %v110_v18 = vpop.permute.xlu0 %109  ;;  %v150_v19 = vmax.f32 %v2590_v35, %v112_v14  ;;  %v245_v14 = vpack.c.bf16 %v2752_v7, %v229_v5  ;;  %v1411_v5 = vsel %vm304_vm2, %v2736_v2, 0 }
  0x9b   :  { %v149_v22 = vmax.f32 %v2594_v36, %v110_v18  ;;  %2086 = vmatmul.mubr.msk.bf16.vlgmr.msra.gmra.mrb[0].mxu1 %vm157_vm0, %v2641_v15  ;;  %2157 = vmatprep.mubr.msk.bf16.mxu0 %vm157_vm0, %v877_v16  ;;  %v866_v23 = vld [vmem:[#allocation2 + $0x98] sm:$0xff] }
  0x9c   :  { %222 = vst.msk [vmem:[#allocation2 + $0x128] sm:$0xff] %vm157_vm0, %v150_v19  ;;  %2102 = vmatpush3.bf16.msra.mxu1 %v430_v17  ;;  %2158 = vmatmul.mubr.msk.bf16.vlgmr.msra.gmra.mrb[0].mxu0 %vm157_vm0, %v878_v13  ;;  %v259_v26 = vld [vmem:[#allocation2 + $0x80] sm:$0xff]  ;;  %v2778_v18 = vld [vmem:[#allocation2 + $0x37] sm:$0xff] }
  0x9d   :  { %221 = vst.msk [vmem:[#allocation2 + $0x110] sm:$0xff] %vm157_vm0, %v149_v22  ;;  %2174 = vmatpush3.bf16.msra.mxu0 %v1078_v20  ;;  %v116_v27 = vpop.permute.xlu1 %115  ;;  %v2663_v28 = vpack.c.bf16 %v259_v26, %v864_v11  ;;  %v879_v29 = vpack.c.bf16 %v866_v23, %v259_v26  ;;  %2377 = vmatprep.subr.msk.bf16.mxu1 %vm304_vm2, %v2651_v21  ;;  %v2676_v36 = vld [vmem:[#allocation2 + $0x39] sm:$0xff]  ;;  %v2711_v59 = vld [vmem:[#allocation2 + $0x81] sm:$0xff]  ;;  %v2782_v20 = vld [vmem:[#allocation2 + $0x4f] sm:$0xff] }
  0x9e   :  { %v114_v30 = vpop.permute.xlu0 %113  ;;  %v152_v32 = vmax.f32 %v2598_v41, %v116_v27  ;;  %2382 = vmatprep.subr.msk.bf16.mxu0 %vm304_vm2, %v1943_v24  ;;  %v2713_v60 = vld [vmem:[#allocation2 + $0x99] sm:$0xff]  ;;  %v246_v24 = vpack.c.bf16 %v2782_v20, %v2778_v18  ;;  %v2790_v26 = vld [vmem:[#allocation2 + $0x67] sm:$0xff]  ;;  %v580_v27 = vsel %vm304_vm2, %v2651_v21, 0 }
  0x9f   :  { %v151_v33 = vmax.f32 %v2602_v42, %v114_v30  ;;  %2089 = vmatprep.mubr.msk.bf16.mxu1 %vm157_vm0, %v2663_v28  ;;  %2161 = vmatprep.mubr.msk.bf16.mxu0 %vm157_vm0, %v879_v29  ;;  %v2673_v34 = vld [vmem:[#allocation2 + $0xc8] sm:$0xff]  ;;  %v1045_v0 = vpack.c.bf16 %v2713_v60, %v2711_v59  ;;  %v2780_v19 = vld [vmem:[#allocation2 + $0x7f] sm:$0xff] }
  0xa0   :  { %224 = vst.msk [vmem:[#allocation2 + $0x158] sm:$0xff] %vm157_vm0, %v152_v32  ;;  %v261_v35 = vld [vmem:[#allocation2 + $0xb0] sm:$0xff]  ;;  %v2683_v42 = vld [vmem:[#allocation2 + $0x21] sm:$0xff]  ;;  %v247_v32 = vpack.c.bf16 %v2780_v19, %v2790_v26 }
  0xa1   :  { %223 = vst.msk [vmem:[#allocation2 + $0x140] sm:$0xff] %vm157_vm0, %v151_v33  ;;  %v120_v37 = vpop.permute.xlu1 %119  ;;  %v2679_v38 = vpack.c.bf16 %v261_v35, %v866_v23  ;;  %v880_v39 = vpack.c.bf16 %v2673_v34, %v261_v35  ;;  %v1043_v45 = vpack.c.bf16 %v2676_v36, %v2683_v42  ;;  %v2754_v8 = vld [vmem:[#allocation2 + $0xb1] sm:$0xff]  ;;  %v2756_v9 = vld [vmem:[#allocation2 + $0xc9] sm:$0xff]  ;;  %v1916_v33 = vld [vmem:[%s3062_s1 + $0x6] sm:$0x3] }
  0xa2   :  { %v118_v40 = vpop.permute.xlu0 %117  ;;  %v154_v41 = vmax.f32 %v2606_v47, %v120_v37  ;;  %v1046_v16 = vpack.c.bf16 %v2756_v9, %v2754_v8  ;;  %v2812_v37 = vld [vmem:[#allocation2 + $0xaf] sm:$0xff] }
  0xa3   :  { %v153_v44 = vmax.f32 %v2610_v48, %v118_v40  ;;  %2090 = vmatmul.mubr.msk.bf16.gmra.mrb[4].mxu1 %vm157_vm0, %v2679_v38  ;;  %v2690_v46 = vld [vmem:[#allocation2 + $0x128] sm:$0xff] }
  0xa4   :  { %226 = vst.msk [vmem:[#allocation2 + $0x188] sm:$0xff] %vm157_vm0, %v154_v41  ;;  %2162 = vmatmul.mubr.msk.bf16.gmra.mrb[4].mxu0 %vm157_vm0, %v880_v39  ;;  %v2694_v49 = vld [vmem:[#allocation2 + $0x110] sm:$0xff] }
  0xa5   :  { %225 = vst.msk [vmem:[#allocation2 + $0x170] sm:$0xff] %vm157_vm0, %v153_v44  ;;  %2175 = vmatprep.mubr.msk.bf16.mxu0 %vm157_vm0, %v1043_v45  ;;  %v124_v47 = vpop.permute.xlu1 %123  ;;  %v274_v48 = vpack.c.bf16 %v2694_v49, %v262_v43  ;;  %v881_v52 = vpack.c.bf16 %v2690_v46, %v2694_v49  ;;  %v2760_v11 = vld [vmem:[#allocation2 + $0x111] sm:$0xff]  ;;  %v2762_v12 = vld [vmem:[#allocation2 + $0x129] sm:$0xff] }
  0xa6   :  { %v122_v50 = vpop.permute.xlu0 %121  ;;  %v156_v51 = vmax.f32 %v2614_v53, %v124_v47  ;;  %v1047_v17 = vpack.c.bf16 %v2762_v12, %v2760_v11  ;;  %v237_v39 = vld [vmem:[#allocation2 + $0xf7] sm:$0xff]  ;;  %v2814_v40 = vld [vmem:[#allocation2 + $0x10f] sm:$0xff] }
  0xa7   :  { %v155_v55 = vmax.f32 %v2618_v54, %v122_v50  ;;  %2093 = vmatprep.mubr.msk.bf16.mxu1 %vm157_vm0, %v274_v48  ;;  %v2706_v57 = vld [vmem:[#allocation2 + $0x158] sm:$0xff]  ;;  %v249_v47 = vpack.c.bf16 %v2814_v40, %v237_v39 }
  0xa8   :  { %228 = vst.msk [vmem:[#allocation2 + $0x1b8] sm:$0xff] %vm157_vm0, %v156_v51  ;;  %v2709_v58 = vld [vmem:[#allocation2 + $0x140] sm:$0xff]  ;;  %v2720_v54 = vld [vmem:[#allocation2 + $0x51] sm:$0xff] }
  0xa9   :  { %227 = vst.msk [vmem:[#allocation2 + $0x1a0] sm:$0xff] %vm157_vm0, %v155_v55  ;;  %v2718_v53 = vpack.c.bf16 %v2709_v58, %v2690_v46  ;;  %v1044_v61 = vpack.c.bf16 %v2704_v56, %v2720_v54  ;;  %v882_v63 = vpack.c.bf16 %v2706_v57, %v2709_v58  ;;  %v2784_v22 = vld [vmem:[#allocation2 + $0x141] sm:$0xff]  ;;  %v2786_v23 = vld [vmem:[#allocation2 + $0x159] sm:$0xff]  ;;  %v546_v39 = vpack.c.bf16 %v2720_v54, %v2676_v36  ;;  %v1541_v46 = vld [vmem:[#allocation2 + $0x1d1] sm:$0xff] }
  0xaa   :  { %v1048_v35 = vpack.c.bf16 %v2786_v23, %v2784_v22  ;;  %v2816_v41 = vld [vmem:[#allocation2 + $0x97] sm:$0xff]  ;;  %v2831_v50 = vld [vmem:[#allocation2 + $0x13f] sm:$0xff]  ;;  %v2835_v55 = vld [vmem:[#allocation2 + $0x127] sm:$0xff]  ;;  %v548_v36 = vpack.c.bf16 %v2754_v8, %v2713_v60 }
  0xab   :  { %2094 = vmatmul.mubr.msk.bf16.gmra.mrb[8].mxu1 %vm157_vm0, %v2718_v53  ;;  %v2731_v1 = vld [vmem:[#allocation2 + $0x188] sm:$0xff]  ;;  %v248_v45 = vpack.c.bf16 %v2812_v37, %v2816_v41 }
  0xac   :  { %2176 = vmatmul.mubr.msk.bf16.vlgmr.msra.gmra.mrb[0].mxu0 %vm157_vm0, %v1044_v61  ;;  %v2739_v3 = vld [vmem:[#allocation2 + $0x170] sm:$0xff]  ;;  %v250_v61 = vpack.c.bf16 %v2831_v50, %v2835_v55 }
  0xad   :  { %2192 = vmatpush3.bf16.msra.mxu0 %v1245_v62  ;;  %2179 = vmatprep.mubr.msk.bf16.mxu0 %vm157_vm0, %v1045_v0  ;;  %v2744_v4 = vpack.c.bf16 %v2739_v3, %v2706_v57  ;;  %v883_v6 = vpack.c.bf16 %v2731_v1, %v2739_v3  ;;  %v2794_v29 = vld [vmem:[#allocation2 + $0x171] sm:$0xff]  ;;  %v2796_v30 = vld [vmem:[#allocation2 + $0x189] sm:$0xff] }
  0xae   :  { %2383 = vmatprep.subr.msk.bf16.mxu0 %vm304_vm2, %v2736_v2  ;;  %v1049_v21 = vpack.c.bf16 %v2796_v30, %v2794_v29  ;;  %v2833_v51 = vld [vmem:[#allocation2 + $0x16f] sm:$0xff]  ;;  %v2839_v62 = vld [vmem:[#allocation2 + $0x157] sm:$0xff]  ;;  %v1201_v2 = vld [vmem:[#allocation2 + $0xdf] sm:$0xff] }
  0xaf   :  { %2097 = vmatprep.mubr.msk.bf16.mxu1 %vm157_vm0, %v2744_v4  ;;  %v2820_v44 = vld [vmem:[#allocation2 + $0x1b9] sm:$0xff]  ;;  %v251_v0 = vpack.c.bf16 %v2833_v51, %v2839_v62 }
  0xb0   :  { %v2758_v10 = vld [vmem:[#allocation2 + $0x1a0] sm:$0xff] }
  0xb1   :  { %v2766_v13 = vpack.c.bf16 %v2758_v10, %v2731_v1  ;;  %v2818_v43 = vld [vmem:[#allocation2 + $0x1a1] sm:$0xff] }
  0xb2   :  { %v1050_v48 = vpack.c.bf16 %v2820_v44, %v2818_v43  ;;  %v552_v8 = vpack.c.bf16 %v2818_v43, %v2796_v30 }
  0xb3   :  { %2098 = vmatmul.mubr.msk.bf16.gmra.mrb[12].mxu1 %vm157_vm0, %v2766_v13 }
  0xb4   :  { %2103 = vmatprep.mubr.msk.bf16.mxu1 %vm157_vm0, %v245_v14  ;;  %2180 = vmatmul.mubr.msk.bf16.gmra.mrb[4].mxu0 %vm157_vm0, %v1046_v16  ;;  %v1961_v14 = vld [vmem:[%s3062_s1 + $0x10] sm:$0x3]  ;;  %v2852_v16 = vld [vmem:[#allocation2 + $0x19f] sm:$0xff] }
  0xb5   :  { %2183 = vmatprep.mubr.msk.bf16.mxu0 %vm157_vm0, %v1047_v17  ;;  %v529_v17 = vld [vmem:[#allocation2 + $0x9] sm:$0xff]  ;;  %v1577_v60 = vsel %vm304_vm2, %v1961_v14, 0 }
  0xbb   :  { %2104 = vmatmul.mubr.msk.bf16.vlgmr.msra.gmra.mrb[0].mxu1 %vm157_vm0, %v246_v24 }
  0xbc   :  { %2107 = vmatprep.mubr.msk.bf16.mxu1 %vm157_vm0, %v247_v32  ;;  %2120 = vmatpush3.bf16.msra.mxu1 %v580_v27  ;;  %v1200_v27 = vld [vmem:[#allocation2 + $0xc7] sm:$0xff] }
  0xbd   :  { %2184 = vmatmul.mubr.msk.bf16.gmra.mrb[8].mxu0 %vm157_vm0, %v1048_v35  ;;  %2378 = vmatprep.subr.msk.bf16.mxu1 %vm304_vm2, %v1916_v33 }
  0xbe   :  { %2187 = vmatprep.mubr.msk.bf16.mxu0 %vm157_vm0, %v1049_v21  ;;  %v545_v21 = vpack.c.bf16 %v2683_v42, %v529_v17  ;;  %v537_v42 = vld [vmem:[#allocation2 + $0xf9] sm:$0xff] }
  0xbf   :  { %v549_v54 = vpack.c.bf16 %v2760_v11, %v537_v42  ;;  %v711_v11 = vpack.c.bf16 %v2778_v18, %v2752_v7  ;;  %v715_v7 = vpack.c.bf16 %v2835_v55, %v2814_v40  ;;  %v1374_v18 = vld [vmem:[#allocation2 + $0x1b8] sm:$0xff] }
  0xc0   :  { %v884_v49 = vpack.c.bf16 %v1374_v18, %v2758_v10 }
  0xc3   :  { %2108 = vmatmul.mubr.msk.bf16.gmra.mrb[4].mxu1 %vm157_vm0, %v248_v45 }
  0xc4   :  { %2111 = vmatprep.mubr.msk.bf16.mxu1 %vm157_vm0, %v249_v47  ;;  %v547_v47 = vpack.c.bf16 %v2711_v59, %v2704_v56  ;;  %v1208_v56 = vld [vmem:[#allocation2 + $0x1b7] sm:$0xff] }
  0xc5   :  { %2188 = vmatmul.mubr.msk.bf16.gmra.mrb[12].mxu0 %vm157_vm0, %v1050_v48  ;;  %v1209_v48 = vld [vmem:[#allocation2 + $0x1cf] sm:$0xff] }
  0xc6   :  { %2193 = vmatprep.mubr.msk.bf16.mxu0 %vm157_vm0, %v246_v24  ;;  %v2855_v24 = vld [vmem:[#allocation2 + $0x187] sm:$0xff]  ;;  %v1217_v59 = vpack.c.bf16 %v1209_v48, %v1208_v56 }
  0xc7   :  { %v252_v35 = vpack.c.bf16 %v2852_v16, %v2855_v24 }
  0xcb   :  { %2112 = vmatmul.mubr.msk.bf16.gmra.mrb[8].mxu1 %vm157_vm0, %v250_v61 }
  0xcc   :  { %2115 = vmatprep.mubr.msk.bf16.mxu1 %vm157_vm0, %v251_v0 }
  0xcd   :  { %2194 = vmatmul.mubr.msk.bf16.vlgmr.msra.gmra.mrb[0].mxu0 %vm157_vm0, %v247_v32  ;;  %v1213_v32 = vpack.c.bf16 %v1201_v2, %v1200_v27 }
  0xce   :  { %2210 = vmatpush3.bf16.msra.mxu0 %v1411_v5  ;;  %2197 = vmatprep.mubr.msk.bf16.mxu0 %vm157_vm0, %v248_v45  ;;  %v746_v45 = vsel %vm304_vm2, %v1916_v33, 0  ;;  %v551_v33 = vpack.c.bf16 %v2794_v29, %v2786_v23 }
  0xcf   :  { %2384 = vmatprep.subr.msk.bf16.mxu0 %vm304_vm2, %v1961_v14 }
  0xd3   :  { %2116 = vmatmul.mubr.msk.bf16.gmra.mrb[12].mxu1 %vm157_vm0, %v252_v35 }
  0xd4   :  { %2121 = vmatprep.mubr.msk.bf16.mxu1 %vm157_vm0, %v545_v21 }
  0xd5   :  { %2198 = vmatmul.mubr.msk.bf16.gmra.mrb[4].mxu0 %vm157_vm0, %v1213_v32 }
  0xd6   :  { %2201 = vmatprep.mubr.msk.bf16.mxu0 %vm157_vm0, %v250_v61 }
  0xdb   :  { %2122 = vmatmul.mubr.msk.bf16.vlgmr.msra.gmra.mrb[0].mxu1 %vm157_vm0, %v546_v39 }
  0xdc   :  { %2125 = vmatprep.mubr.msk.bf16.mxu1 %vm157_vm0, %v547_v47  ;;  %2138 = vmatpush3.bf16.msra.mxu1 %v746_v45 }
  0xdd   :  { %2202 = vmatmul.mubr.msk.bf16.gmra.mrb[8].mxu0 %vm157_vm0, %v251_v0  ;;  %2380 = vmatprep.subr.msk.bf16.mxu1 %vm304_vm2, %v2560_v25  ;;  %v550_v25 = vpack.c.bf16 %v2784_v22, %v2762_v12 }
  0xde   :  { %2205 = vmatprep.mubr.msk.bf16.mxu0 %vm157_vm0, %v252_v35 }
  0xe3   :  { %2126 = vmatmul.mubr.msk.bf16.gmra.mrb[4].mxu1 %vm157_vm0, %v548_v36 }
  0xe4   :  { %2129 = vmatprep.mubr.msk.bf16.mxu1 %vm157_vm0, %v549_v54 }
  0xe5   :  { %2206 = vmatmul.mubr.msk.bf16.gmra.mrb[12].mxu0 %vm157_vm0, %v1217_v59 }
  0xe6   :  { %2211 = vmatprep.mubr.msk.bf16.mxu0 %vm157_vm0, %v2641_v15  ;;  %v1367_v15 = vld [vmem:[#allocation2 + $0xe0] sm:$0xff] }
  0xe7   :  { %v1379_v12 = vpack.c.bf16 %v1367_v15, %v2673_v34  ;;  %v1375_v34 = vld [vmem:[#allocation2 + $0x1d0] sm:$0xff] }
  0xeb   :  { %2130 = vmatmul.mubr.msk.bf16.gmra.mrb[8].mxu1 %vm157_vm0, %v550_v25 }
  0xec   :  { %2133 = vmatprep.mubr.msk.bf16.mxu1 %vm157_vm0, %v551_v33 }
  0xed   :  { %2212 = vmatmul.mubr.msk.bf16.vlgmr.msra.gmra.mrb[0].mxu0 %vm157_vm0, %v2663_v28  ;;  %v712_v28 = vpack.c.bf16 %v2790_v26, %v2782_v20  ;;  %v718_v20 = vpack.c.bf16 %v1208_v56, %v2852_v16 }
  0xee   :  { %2228 = vmatpush3.bf16.msra.mxu0 %v1577_v60  ;;  %2215 = vmatprep.mubr.msk.bf16.mxu0 %vm157_vm0, %v2679_v38  ;;  %v713_v38 = vpack.c.bf16 %v2816_v41, %v2780_v19  ;;  %v1383_v19 = vpack.c.bf16 %v1375_v34, %v1374_v18 }
  0xf3   :  { %2134 = vmatmul.mubr.msk.bf16.gmra.mrb[12].mxu1 %vm157_vm0, %v552_v8 }
  0xf4   :  { %2139 = vmatprep.mubr.msk.bf16.mxu1 %vm157_vm0, %v711_v11 }
  0xf5   :  { %2216 = vmatmul.mubr.msk.bf16.gmra.mrb[4].mxu0 %vm157_vm0, %v1379_v12 }
  0xf6   :  { %2219 = vmatprep.mubr.msk.bf16.mxu0 %vm157_vm0, %v2718_v53  ;;  %v714_v53 = vpack.c.bf16 %v1200_v27, %v2812_v37 }
  0xfb   :  { %2140 = vmatmul.mubr.msk.bf16.vlgmr.msra.gmra.mrb[0].mxu1 %vm157_vm0, %v712_v28 }
  0xfc   :  { %2143 = vmatprep.mubr.msk.bf16.mxu1 %vm157_vm0, %v713_v38  ;;  %2246 = vmatpush3.bf16.msra.mxu1 %v2576_v31  ;;  %v716_v31 = vpack.c.bf16 %v2839_v62, %v2831_v50 }
  0xfd   :  { %2220 = vmatmul.mubr.msk.bf16.gmra.mrb[8].mxu0 %vm157_vm0, %v2744_v4  ;;  %v717_v4 = vpack.c.bf16 %v2855_v24, %v2833_v51 }
  0xfe   :  { %2223 = vmatprep.mubr.msk.bf16.mxu0 %vm157_vm0, %v2766_v13  ;;  %v1533_v13 = vld [vmem:[#allocation2 + $0xe1] sm:$0xff] }
  0xff   :  { %v1545_v22 = vpack.c.bf16 %v1533_v13, %v2756_v9 }
 0x103   :  { %2144 = vmatmul.mubr.msk.bf16.gmra.mrb[4].mxu1 %vm157_vm0, %v714_v53 }
 0x104   :  { %2147 = vmatprep.mubr.msk.bf16.mxu1 %vm157_vm0, %v715_v7 }
 0x105   :  { %2224 = vmatmul.mubr.msk.bf16.gmra.mrb[12].mxu0 %vm157_vm0, %v1383_v19 }
 0x106   :  { %2229 = vmatprep.mubr.msk.bf16.mxu0 %vm157_vm0, %v546_v39 }
 0x10b   :  { %2148 = vmatmul.mubr.msk.bf16.gmra.mrb[8].mxu1 %vm157_vm0, %v716_v31 }
 0x10c   :  { %2151 = vmatprep.mubr.msk.bf16.mxu1 %vm157_vm0, %v717_v4 }
 0x10d   :  { %2230 = vmatmul.mubr.msk.bf16.vlgmr.msra.gmra.mrb[0].mxu0 %vm157_vm0, %v547_v47 }
 0x10e   :  { %2233 = vmatprep.mubr.msk.bf16.mxu0 %vm157_vm0, %v548_v36 }
 0x113   :  { %2152 = vmatmul.mubr.msk.bf16.gmra.mrb[12].mxu1 %vm157_vm0, %v718_v20 }
 0x114   :  { %2165 = vmatprep.mubr.msk.bf16.mxu1 %vm157_vm0, %v881_v52  ;;  %v1549_v52 = vpack.c.bf16 %v1541_v46, %v2820_v44 }
 0x115   :  { %2234 = vmatmul.mubr.msk.bf16.gmra.mrb[4].mxu0 %vm157_vm0, %v1545_v22 }
 0x116   :  { %2237 = vmatprep.mubr.msk.bf16.mxu0 %vm157_vm0, %v550_v25 }
 0x11b   :  { %2166 = vmatmul.mubr.msk.bf16.vlgmr.msra.gmra.mrb[8].mxu1 %vm157_vm0, %v882_v63 }
 0x11c   :  { %2169 = vmatprep.mubr.msk.bf16.mxu1 %vm157_vm0, %v883_v6 }
 0x11d   :  { %2238 = vmatmul.mubr.msk.bf16.gmra.mrb[8].mxu0 %vm157_vm0, %v551_v33 }
 0x11e   :  { %2241 = vmatprep.mubr.msk.bf16.mxu0 %vm157_vm0, %v552_v8 }
 0x123   :  { %2170 = vmatmul.mubr.msk.bf16.gmra.mrb[12].mxu1 %vm157_vm0, %v884_v49 }
 0x125   :  { %2242 = vmatmul.mubr.msk.bf16.gmra.mrb[12].mxu0 %vm157_vm0, %v1549_v52 }
 0x1ce   :  { %v2141_v57 = vpop.f32.mrb[0].mxu1 }
 0x1cf   :  { %v782_v58 = vpop.f32.mrb[1].mxu1 }
 0x1d0   :  { %v2142_v63 = vpop.f32.mrb[2].mxu1 }
 0x1d1   :  { %v785_v9 = vpop.f32.mrb[3].mxu1 }
 0x1d6   :  { %v2145_v1 = vpop.f32.mrb[4].mxu1 }
 0x1d7   :  { %v798_v3 = vpop.f32.mrb[5].mxu1 }
 0x1d8   :  { %v2146_v6 = vpop.f32.mrb[6].mxu1 }
 0x1d9   :  { %v801_v23 = vpop.f32.mrb[7].mxu1 }
 0x1e0   :  { %v2231_v26 = vpop.f32.mrb[0].mxu0 }
 0x1e1   :  { %v2247_v29 = vadd.f32 %v2231_v26, %v2141_v57  ;;  %v1613_v30 = vpop.f32.mrb[1].mxu0 }
 0x1e2   :  { %v2248_v37 = vadd.f32 %v1613_v30, %v782_v58  ;;  %v2232_v10 = vpop.f32.mrb[2].mxu0 }
 0x1e3   :  { %v1988_v40 = vpack.c.bf16 %v2247_v29, %v2247_v29  ;;  %v2249_v41 = vadd.f32 %v2232_v10, %v2142_v63  ;;  %v1616_v43 = vpop.f32.mrb[3].mxu0  ;;  %v1694_v55 = vmul.f32 %v2247_v29, %v2247_v29  ;;  %v1712_v24 = vsel %vm1708_vm4, %v2247_v29, 0.0 }
 0x1e4   :  { %v1692_v44 = vmul.f32 %v2248_v37, %v2248_v37  ;;  %v1986_v50 = vpack.c.bf16 %v2248_v37, %v2248_v37  ;;  %v2250_v51 = vadd.f32 %v1616_v43, %v785_v9  ;;  %v1709_v62 = vsel %vm1708_vm4, %v2248_v37, 0.0 }
 0x1e5   :  { %1857 = vst.msk [vmem:[%s3063_s2 + $0x8] sm:$0xf] %vm1854_vm3, %v1988_v40  ;;  %v1989_v61 = vpack.c.bf16 %v2249_v41, %v2249_v41  ;;  %v1695_v16 = vmul.f32 %v2249_v41, %v2249_v41  ;;  %v1749_v47 = vsel %vm1708_vm4, %v1694_v55, 0.0  ;;  %v1714_v36 = vsel %vm1708_vm4, %v2249_v41, 0.0 }
 0x1e6   :  { %1855 = vst.msk [vmem:[%s3063_s2] sm:$0xf] %vm1854_vm3, %v1986_v50  ;;  %v1693_v0 = vmul.f32 %v2250_v51, %v2250_v51  ;;  %v1710_v5 = vsel %vm1708_vm4, %v2250_v51, 0.0  ;;  %v1987_v14 = vpack.c.bf16 %v2250_v51, %v2250_v51  ;;  %v1746_v27 = vsel %vm1708_vm4, %v1692_v44, 0.0 }
 0x1e7   :  { %1858 = vst.msk [vmem:[%s3063_s2 + $0xc] sm:$0xf] %vm1854_vm3, %v1989_v61  ;;  %v1711_v17 = vadd.f32 %v1710_v5, %v1709_v62  ;;  %v1751_v54 = vsel %vm1708_vm4, %v1695_v16, 0.0 }
 0x1e8   :  { %v1747_v2 = vsel %vm1708_vm4, %v1693_v0, 0.0  ;;  %1856 = vst.msk [vmem:[%s3063_s2 + $0x4] sm:$0xf] %vm1854_vm3, %v1987_v14  ;;  %v2235_v35 = vpop.f32.mrb[4].mxu0 }
 0x1e9   :  { %v1713_v21 = vadd.f32 %v1712_v24, %v1711_v17  ;;  %v1748_v32 = vadd.f32 %v1747_v2, %v1746_v27  ;;  %v2251_v39 = vadd.f32 %v2235_v35, %v2145_v1  ;;  %v1629_v45 = vpop.f32.mrb[5].mxu0 }
 0x1ea   :  { %v2252_v42 = vadd.f32 %v1629_v45, %v798_v3  ;;  %v2236_v48 = vpop.f32.mrb[6].mxu0 }
 0x1eb   :  { %v1750_v56 = vadd.f32 %v1749_v47, %v1748_v32  ;;  %v1992_v59 = vpack.c.bf16 %v2251_v39, %v2251_v39  ;;  %v1632_v25 = vpop.f32.mrb[7].mxu0  ;;  %v1715_v60 = vadd.f32 %v1714_v36, %v1713_v21  ;;  %v2253_v12 = vadd.f32 %v2236_v48, %v2146_v6 }
 0x1ec   :  { %v1696_v33 = vmul.f32 %v2252_v42, %v2252_v42  ;;  %v1716_v15 = vsel %vm1708_vm4, %v2252_v42, 0.0  ;;  %v1990_v8 = vpack.c.bf16 %v2252_v42, %v2252_v42  ;;  %v2254_v28 = vadd.f32 %v1632_v25, %v801_v23 }
 0x1ed   :  { %1861 = vst.msk [vmem:[%s3063_s2 + $0x18] sm:$0xf] %vm1854_vm3, %v1992_v59  ;;  %v1752_v11 = vadd.f32 %v1751_v54, %v1750_v56  ;;  %v1717_v38 = vadd.f32 %v1716_v15, %v1715_v60  ;;  %v1698_v7 = vmul.f32 %v2251_v39, %v2251_v39  ;;  %v1993_v19 = vpack.c.bf16 %v2253_v12, %v2253_v12 }
 0x1ee   :  { %v1753_v34 = vsel %vm1708_vm4, %v1696_v33, 0.0  ;;  %1859 = vst.msk [vmem:[%s3063_s2 + $0x10] sm:$0xf] %vm1854_vm3, %v1990_v8  ;;  %v2167_v53 = vpop.f32.mrb[8].mxu1  ;;  %v1697_v4 = vmul.f32 %v2254_v28, %v2254_v28  ;;  %v1718_v13 = vsel %vm1708_vm4, %v2254_v28, 0.0  ;;  %v1991_v20 = vpack.c.bf16 %v2254_v28, %v2254_v28 }
 0x1ef   :  { %v1754_v18 = vadd.f32 %v1753_v34, %v1752_v11  ;;  %v980_v31 = vpop.f32.mrb[9].mxu1  ;;  %1862 = vst.msk [vmem:[%s3063_s2 + $0x1c] sm:$0xf] %vm1854_vm3, %v1993_v19  ;;  %v1719_v49 = vadd.f32 %v1718_v13, %v1717_v38  ;;  %v1720_v63 = vsel %vm1708_vm4, %v2251_v39, 0.0  ;;  %v1699_v9 = vmul.f32 %v2253_v12, %v2253_v12 }
 0x1f0   :  { %v2239_v22 = vpop.f32.mrb[8].mxu0  ;;  %v2168_v46 = vpop.f32.mrb[10].mxu1  ;;  %v1755_v1 = vsel %vm1708_vm4, %v1697_v4, 0.0  ;;  %1860 = vst.msk [vmem:[%s3063_s2 + $0x14] sm:$0xf] %vm1854_vm3, %v1991_v20  ;;  %v1757_v23 = vsel %vm1708_vm4, %v1698_v7, 0.0 }
 0x1f1   :  { %v2255_v52 = vadd.f32 %v2239_v22, %v2167_v53  ;;  %v1645_v57 = vpop.f32.mrb[9].mxu0  ;;  %v983_v58 = vpop.f32.mrb[11].mxu1  ;;  %v1722_v26 = vsel %vm1708_vm4, %v2253_v12, 0.0  ;;  %v1721_v29 = vadd.f32 %v1720_v63, %v1719_v49  ;;  %v1756_v30 = vadd.f32 %v1755_v1, %v1754_v18 }
 0x1f2   :  { %v2256_v3 = vadd.f32 %v1645_v57, %v980_v31  ;;  %v2240_v6 = vpop.f32.mrb[10].mxu0  ;;  %v1759_v55 = vsel %vm1708_vm4, %v1699_v9, 0.0 }
 0x1f3   :  { %v1648_v37 = vpop.f32.mrb[11].mxu0  ;;  %v1996_v10 = vpack.c.bf16 %v2255_v52, %v2255_v52  ;;  %v1758_v44 = vadd.f32 %v1757_v23, %v1756_v30  ;;  %v1723_v50 = vadd.f32 %v1722_v26, %v1721_v29  ;;  %v2257_v51 = vadd.f32 %v2240_v6, %v2168_v46 }
 0x1f4   :  { %v1700_v40 = vmul.f32 %v2256_v3, %v2256_v3  ;;  %v1724_v41 = vsel %vm1708_vm4, %v2256_v3, 0.0  ;;  %v1994_v43 = vpack.c.bf16 %v2256_v3, %v2256_v3  ;;  %v2258_v62 = vadd.f32 %v1648_v37, %v983_v58 }
 0x1f5   :  { %1865 = vst.msk [vmem:[%s3063_s2 + $0x28] sm:$0xf] %vm1854_vm3, %v1996_v10  ;;  %v1702_v5 = vmul.f32 %v2255_v52, %v2255_v52  ;;  %v1725_v14 = vadd.f32 %v1724_v41, %v1723_v50  ;;  %v1760_v16 = vadd.f32 %v1759_v55, %v1758_v44  ;;  %v1997_v24 = vpack.c.bf16 %v2257_v51, %v2257_v51 }
 0x1f6   :  { %v1761_v61 = vsel %vm1708_vm4, %v1700_v40, 0.0  ;;  %1863 = vst.msk [vmem:[%s3063_s2 + $0x20] sm:$0xf] %vm1854_vm3, %v1994_v43  ;;  %v2171_v0 = vpop.f32.mrb[12].mxu1  ;;  %v1701_v27 = vmul.f32 %v2258_v62, %v2258_v62  ;;  %v1726_v2 = vsel %vm1708_vm4, %v2258_v62, 0.0  ;;  %v1995_v35 = vpack.c.bf16 %v2258_v62, %v2258_v62 }
 0x1f7   :  { %v996_v17 = vpop.f32.mrb[13].mxu1  ;;  %v1762_v39 = vadd.f32 %v1761_v61, %v1760_v16  ;;  %v1727_v45 = vadd.f32 %v1726_v2, %v1725_v14  ;;  %v1728_v36 = vsel %vm1708_vm4, %v2255_v52, 0.0  ;;  %v1703_v54 = vmul.f32 %v2257_v51, %v2257_v51  ;;  %1866 = vst.msk [vmem:[%s3063_s2 + $0x2c] sm:$0xf] %vm1854_vm3, %v1997_v24 }
 0x1f8   :  { %v2243_v21 = vpop.f32.mrb[12].mxu0  ;;  %v2172_v32 = vpop.f32.mrb[14].mxu1  ;;  %v1763_v56 = vsel %vm1708_vm4, %v1701_v27, 0.0  ;;  %1864 = vst.msk [vmem:[%s3063_s2 + $0x24] sm:$0xf] %vm1854_vm3, %v1995_v35  ;;  %v1765_v33 = vsel %vm1708_vm4, %v1702_v5, 0.0 }
 0x1f9   :  { %v2259_v47 = vadd.f32 %v2243_v21, %v2171_v0  ;;  %v1661_v42 = vpop.f32.mrb[13].mxu0  ;;  %v999_v48 = vpop.f32.mrb[15].mxu1  ;;  %v1730_v60 = vsel %vm1708_vm4, %v2257_v51, 0.0  ;;  %v1729_v15 = vadd.f32 %v1728_v36, %v1727_v45  ;;  %v1764_v8 = vadd.f32 %v1763_v56, %v1762_v39 }
 0x1fa   :  { %v2260_v59 = vadd.f32 %v1661_v42, %v996_v17  ;;  %v2244_v25 = vpop.f32.mrb[14].mxu0  ;;  %v1767_v19 = vsel %vm1708_vm4, %v1703_v54, 0.0 }
 0x1fb   :  { %v1664_v11 = vpop.f32.mrb[15].mxu0  ;;  %v2000_v12 = vpack.c.bf16 %v2259_v47, %v2259_v47  ;;  %v1766_v53 = vadd.f32 %v1765_v33, %v1764_v8  ;;  %v1731_v7 = vadd.f32 %v1730_v60, %v1729_v15  ;;  %v2261_v18 = vadd.f32 %v2244_v25, %v2172_v32 }
 0x1fc   :  { %v1704_v28 = vmul.f32 %v2260_v59, %v2260_v59  ;;  %v1732_v38 = vsel %vm1708_vm4, %v2260_v59, 0.0  ;;  %v1998_v34 = vpack.c.bf16 %v2260_v59, %v2260_v59  ;;  %v2262_v4 = vadd.f32 %v1664_v11, %v999_v48 }
 0x1fd   :  { %1869 = vst.msk [vmem:[%s3063_s2 + $0x38] sm:$0xf] %vm1854_vm3, %v2000_v12  ;;  %v1706_v13 = vmul.f32 %v2259_v47, %v2259_v47  ;;  %v1733_v20 = vadd.f32 %v1732_v38, %v1731_v7  ;;  %v1768_v22 = vadd.f32 %v1767_v19, %v1766_v53  ;;  %v2001_v46 = vpack.c.bf16 %v2261_v18, %v2261_v18 }
 0x1fe   :  { %v1769_v31 = vsel %vm1708_vm4, %v1704_v28, 0.0  ;;  %1867 = vst.msk [vmem:[%s3063_s2 + $0x30] sm:$0xf] %vm1854_vm3, %v1998_v34  ;;  %v1705_v49 = vmul.f32 %v2262_v4, %v2262_v4  ;;  %v1734_v52 = vsel %vm1708_vm4, %v2262_v4, 0.0  ;;  %v1999_v57 = vpack.c.bf16 %v2262_v4, %v2262_v4 }
 0x1ff   :  { %v1770_v58 = vadd.f32 %v1769_v31, %v1768_v22  ;;  %v1735_v63 = vadd.f32 %v1734_v52, %v1733_v20  ;;  %v1736_v9 = vsel %vm1708_vm4, %v2259_v47, 0.0  ;;  %v1707_v1 = vmul.f32 %v2261_v18, %v2261_v18  ;;  %1870 = vst.msk [vmem:[%s3063_s2 + $0x3c] sm:$0xf] %vm1854_vm3, %v2001_v46 }
 0x200   :  { %v1771_v3 = vsel %vm1708_vm4, %v1705_v49, 0.0  ;;  %1868 = vst.msk [vmem:[%s3063_s2 + $0x34] sm:$0xf] %vm1854_vm3, %v1999_v57  ;;  %v1773_v26 = vsel %vm1708_vm4, %v1706_v13, 0.0  ;;  %v1738_v29 = vsel %vm1708_vm4, %v2261_v18, 0.0  ;;  %s2444_s2 = smov [#allocation6]  }
 0x201   :  { %v1737_v6 = vadd.f32 %v1736_v9, %v1735_v63  ;;  %v1772_v23 = vadd.f32 %v1771_v3, %v1770_v58  ;;  %v1775_v10 = vsel %vm1708_vm4, %v1707_v1, 0.0  ;;  %s1879_s19 = sshll.u32 %s2444_s2, 4  ;;  %s1880_s19 = int_to_ptr.vmem [resolvable:$true] %s1879_s19 }
 0x202   :  { %s2413_s20 = scalar_lea.vmem %s1880_s19, 32  ;;  %p2418_p9 = scmp.lt.s32.totalorder %s1880_s19, %s1880_s19 }
 0x203   :  { %v1739_v30 = vadd.f32 %v1738_v29, %v1737_v6  ;;  %v1774_v37 = vadd.f32 %v1773_v26, %v1772_v23  ;;  %p2414_p8 = scmp.ne.s32.totalorder %s1880_s19, %s2413_s20  ;;  %p2419_p10 = scmp.lt.s32.totalorder %s2413_s20, %s2413_s20 }
 0x205   :  { %v1740_v40 = vrot.slane %v1739_v30, 4  ;;  %v1776_v41 = vadd.f32 %v1775_v10, %v1774_v37  ;;  %p2420_p11 = por %p2419_p10, %p2418_p9 }
 0x207   :  { %v1741_v43 = vadd.f32 %v1740_v40, %v1739_v30  ;;  %v1777_v44 = vrot.slane %v1776_v41, 4  ;;  %p2421_p12 = pnand %p2420_p11, %p2414_p8 }
 0x209   :  { %v1742_v50 = vrot.slane %v1741_v43, 2  ;;  %v1778_v51 = vadd.f32 %v1777_v44, %v1776_v41 }
 0x20b   :  { %v1743_v55 = vadd.f32 %v1742_v50, %v1741_v43  ;;  %v1779_v61 = vrot.slane %v1778_v51, 2 }
 0x20d   :  { %v1744_v62 = vrot.slane %v1743_v55, 1  ;;  %v1780_v0 = vadd.f32 %v1779_v61, %v1778_v51 }
 0x20f   :  { %v1781_v5 = vrot.slane %v1780_v0, 1  ;;  %v1745_v14 = vadd.f32 %v1744_v62, %v1743_v55 }
 0x211   :  { %v1782_v16 = vadd.f32 %v1781_v5, %v1780_v0 }
 0x213   :  { %v1786_v17 = vsel %vm1785_vm5, %v1782_v16, %v1745_v14 }
 0x214   :  { %1789 = vst.msk [vmem:[#allocation6] sm:$0x3] %vm1788_vm6, %v1786_v17 }
 0x215   :  { %2424 = shalt.err (!%p2421_p12)
}
 0x216   :  { %s2425_s23 = scalar_lea.hbm %s3064_s3, 32 }
 0x217   :  { %p2426_p13 = scmp.ne.s32.totalorder %s3064_s3, %s2425_s23  ;;  %p2429_p0 = scmp.lt.u32.totalorder %s2425_s23, %s3064_s3 }
 0x219   :  { %p2431_p1 = pnand %p2429_p0, %p2426_p13 }
 0x21b   :  { %2434 = shalt.err (!%p2431_p1)
}
 0x21c   :  { %1882 = dma.vmem_to_hbm [thread:$0]  %s1880_s19, 32, %s3064_s3, [#allocation5]  }
 0x21d   :  { %2437 = dma.done.wait [#allocation5], 32  }
 0x21e   :  { %2438 = vsyncadd [#allocation5], 4294967264 }
 0x21f   :  { %1888 = vsyncpa [#allocation4], 1 }
 0x220   :  { %1889 = vsyncpa [#allocation5], 1 }

</bundles_post_ra>
